<compile_context>
chip_gen: v5e
topology: v5e:2x2
jax: 0.10.0
libtpu: 0.0.40
codegen_flags: <defaults>
</compile_context>

<pallas_src>
import math

import jax
import jax.numpy as jnp
from jax.experimental import pallas as pl
from jax.experimental.pallas import tpu as pltpu

IN_SHAPE = (4, 16, 16)      # in_dim = 1024
NUM_CLASSES = 2
_NP = 128                   # classes padded (once, at param prep) to one 128-lane tile
_NEG = -1e30                # masked-lane logit value -> softmax weight exactly 0


def _round_up(x, m):
    return (x + m - 1) // m * m


def _choose_tm(M):
    """Rows per grid step: full-extent block for tiny batches, otherwise a
    multiple-of-8 block sized so there are >= 2 blocks (v7x: both TensorCores
    get work), capped at 1024 rows (amortizes grid-step overhead, fits VMEM)."""
    if M < 16:
        return M
    return min(1024, _round_up(pl.cdiv(M, 2), 8))


# ------------------------------ Pallas kernel --------------------------------

def _linear_softmax_kernel(x_ref, w_ref, b_ref, o_ref):
    """o = softmax(x @ w + b) over the first NUM_CLASSES lanes, one M tile per step."""
    x = x_ref[...].astype(jnp.bfloat16)                 # in-kernel cast, bf16 MXU input
    logits = jnp.dot(x, w_ref[...], preferred_element_type=jnp.float32)
    logits = logits + b_ref[...]
    lane = jax.lax.broadcasted_iota(jnp.int32, logits.shape, 1)
    logits = jnp.where(lane < NUM_CLASSES, logits, _NEG)    # kill padded class lanes
    m = jnp.max(logits, axis=-1, keepdims=True)
    e = jnp.exp(logits - m)
    inv = pl.reciprocal(jnp.sum(e, axis=-1, keepdims=True), approx=True)  # EUP, free slot
    probs = e * inv
    o_ref[...] = probs[:, :NUM_CLASSES].astype(o_ref.dtype)  # thin (tm, 2) writeback


def pallas_linear_softmax(x2d, w_pad, b_pad):
    """softmax(x @ w + b); w is (K, 128) bf16 (classes zero-padded), b is (1, 128) f32."""
    M, K = x2d.shape
    assert w_pad.shape == (K, _NP), "weight must be prepped as (in_dim, 128)"

    tm = _choose_tm(M)
    grid_m = pl.cdiv(M, tm)                              # edge block partial/masked

    return pl.pallas_call(
        _linear_softmax_kernel,
        grid=(grid_m,),
        in_specs=[
            pl.BlockSpec((tm, K), lambda i: (i, 0)),     # activations, full K per tile
            pl.BlockSpec((K, _NP), lambda i: (0, 0)),    # weight: VMEM-resident
            pl.BlockSpec((1, _NP), lambda i: (0, 0)),    # bias:   VMEM-resident
        ],
        out_specs=pl.BlockSpec((tm, NUM_CLASSES), lambda i: (i, 0)),
        out_shape=jax.ShapeDtypeStruct((M, NUM_CLASSES), jnp.float32),
        compiler_params=pltpu.CompilerParams(
            dimension_semantics=("parallel",)),
    )(x2d, w_pad, b_pad)


# ------------------------------ model wrapper ---------------------------------

def init_params(key, in_dim):
    """torch.nn.Linear(in_dim, 2)-style init, prepped ONCE for the kernel:
    transposed to (K, N), classes zero-padded to 128 lanes, weight cast to bf16."""
    kw, kb = jax.random.split(key)
    bound = 1.0 / math.sqrt(in_dim)
    w = jax.random.uniform(kw, (NUM_CLASSES, in_dim), jnp.float32, -bound, bound)
    b = jax.random.uniform(kb, (NUM_CLASSES,), jnp.float32, -bound, bound)

    w_pad = jnp.zeros((in_dim, _NP), jnp.float32).at[:, :NUM_CLASSES].set(w.T)
    b_pad = jnp.zeros((1, _NP), jnp.float32).at[0, :NUM_CLASSES].set(b)
    return {"w": w_pad.astype(jnp.bfloat16), "b": b_pad}


def logistic_regression_forward(x, params):
    """MyLogisticRegression.forward: softmax(Linear(x.flatten(1).float()), dim=1)."""
    w, b = params["w"], params["b"]
    M = x.shape[0]
    x2d = x.reshape(M, -1).astype(jnp.float32)           # x.flatten(1).float()
    assert x2d.shape[1] == w.shape[0], "in_dim mismatch with prepped weight"
    return pallas_linear_softmax(x2d, w, b)


# ----------------------------------- main --------------------------------------

if __name__ == "__main__":
    key = jax.random.PRNGKey(0)
    kx, kp = jax.random.split(key)
    batch = 2
    in_dim = IN_SHAPE[0] * IN_SHAPE[1] * IN_SHAPE[2]

    x = jax.random.normal(kx, (batch, *IN_SHAPE), jnp.float32)   # NCHW, like PyTorch
    params = init_params(kp, in_dim)

    fwd = jax.jit(logistic_regression_forward)
    y = jax.block_until_ready(fwd(x, params))

    assert y.shape == (batch, NUM_CLASSES)
    assert bool(jnp.all(jnp.isfinite(y)))
    assert bool(jnp.allclose(jnp.sum(y, axis=1), 1.0, atol=2e-3))

    # pure-JAX reference (same bf16-stored weights, f32 activations)
    w_ref = params["w"][:, :NUM_CLASSES].astype(jnp.float32)
    b_ref = params["b"][0, :NUM_CLASSES]
    ref = jax.nn.softmax(x.reshape(batch, -1) @ w_ref + b_ref, axis=1)
    assert bool(jnp.allclose(y, ref, atol=2e-2))

    print("KERNEL_OK")
</pallas_src>

<mosaic_0001>
module attributes {stable_mosaic.version = 11 : i64} {
  func.func @_linear_softmax_kernel(%arg0: i32, %arg1: memref<2x1024xf32, #tpu.memory_space<vmem>>, %arg2: memref<1024x128xbf16, #tpu.memory_space<vmem>>, %arg3: memref<1x128xf32, #tpu.memory_space<vmem>>, %arg4: memref<2x2xf32, #tpu.memory_space<vmem>>) attributes {dimension_semantics = [#tpu.dimension_semantics<parallel>], iteration_bounds = array<i64: 1>, scalar_prefetch = 0 : i64, scratch_operands = 0 : i64, tpu.core_type = #tpu.core_type<tc>, window_params = [{transform_indices = @transform_0, window_bounds = array<i64: 2, 1024>}, {pipeline_mode = #tpu.pipeline_mode<synchronous>, transform_indices = @transform_1, window_bounds = array<i64: 1024, 128>}, {pipeline_mode = #tpu.pipeline_mode<synchronous>, transform_indices = @transform_2, window_bounds = array<i64: 1, 128>}, {transform_indices = @transform_3, window_bounds = array<i64: 2, 2>}]} {
    %c0 = arith.constant 0 : index
    %c0_0 = arith.constant 0 : index
    %0 = vector.load %arg1[%c0, %c0_0] : memref<2x1024xf32, #tpu.memory_space<vmem>>, vector<2x1024xf32>
    %1 = arith.truncf %0 : vector<2x1024xf32> to vector<2x1024xbf16>
    %c0_1 = arith.constant 0 : index
    %c0_2 = arith.constant 0 : index
    %2 = vector.load %arg2[%c0_1, %c0_2] : memref<1024x128xbf16, #tpu.memory_space<vmem>>, vector<1024x128xbf16>
    %cst = arith.constant dense<0.000000e+00> : vector<2x128xf32>
    %3 = tpu.matmul %1, %2, %cst {dimension_numbers = #tpu.dot_dimension_numbers<[1], [0], [0], [1], [0, 0, 1, 1], [], []>} : vector<2x1024xbf16>, vector<1024x128xbf16>, vector<2x128xf32> -> vector<2x128xf32>
    %c0_3 = arith.constant 0 : index
    %c0_4 = arith.constant 0 : index
    %4 = vector.load %arg3[%c0_3, %c0_4] : memref<1x128xf32, #tpu.memory_space<vmem>>, vector<1x128xf32>
    %5 = vector.broadcast %4 : vector<1x128xf32> to vector<2x128xf32>
    %6 = arith.addf %3, %5 : vector<2x128xf32>
    %7 = tpu.iota {dimensions = array<i32: 1>} : vector<2x128xi32>
    %c2_i32 = arith.constant 2 : i32
    %8 = vector.broadcast %c2_i32 : i32 to vector<2x128xi32>
    %9 = arith.cmpi slt, %7, %8 : vector<2x128xi32>
    %cst_5 = arith.constant -1.000000e+30 : f32
    %10 = vector.broadcast %cst_5 : f32 to vector<2x128xf32>
    %11 = arith.select %9, %6, %10 : vector<2x128xi1>, vector<2x128xf32>
    %cst_6 = arith.constant dense<0xFF800000> : vector<2xf32>
    %12 = vector.multi_reduction <maximumf>, %11, %cst_6 [1] : vector<2x128xf32> to vector<2xf32>
    %13 = vector.shape_cast %12 : vector<2xf32> to vector<2x1xf32>
    %14 = vector.broadcast %13 : vector<2x1xf32> to vector<2x128xf32>
    %15 = arith.subf %11, %14 : vector<2x128xf32>
    %16 = math.exp %15 : vector<2x128xf32>
    %cst_7 = arith.constant dense<0.000000e+00> : vector<2xf32>
    %17 = vector.multi_reduction <add>, %16, %cst_7 [1] : vector<2x128xf32> to vector<2xf32>
    %18 = vector.shape_cast %17 : vector<2xf32> to vector<2x1xf32>
    %19 = tpu.reciprocal %18 {approx = true} : vector<2x1xf32> -> vector<2x1xf32>
    %20 = vector.broadcast %19 : vector<2x1xf32> to vector<2x128xf32>
    %21 = arith.mulf %16, %20 : vector<2x128xf32>
    %22 = vector.extract_strided_slice %21 {offsets = [0, 0], sizes = [2, 2], strides = [1, 1]} : vector<2x128xf32> to vector<2x2xf32>
    %c0_8 = arith.constant 0 : index
    %c0_9 = arith.constant 0 : index
    %23 = vector.load %arg4[%c0_8, %c0_9] : memref<2x2xf32, #tpu.memory_space<vmem>>, vector<2x2xf32>
    tpu.vector_store %arg4[%c0_8, %c0_9], %22 {strides = array<i32>} : memref<2x2xf32, #tpu.memory_space<vmem>>, vector<2x2xf32>,
    return
  }
  func.func @transform_0(%arg0: i32) -> (i32, i32) {
    %c0_i32 = arith.constant 0 : i32
    %c0_i32_0 = arith.constant 0 : i32
    return %arg0, %c0_i32 : i32, i32
  }
  func.func @transform_1(%arg0: i32) -> (i32, i32) {
    %c0_i32 = arith.constant 0 : i32
    %c0_i32_0 = arith.constant 0 : i32
    %c0_i32_1 = arith.constant 0 : i32
    return %c0_i32, %c0_i32_0 : i32, i32
  }
  func.func @transform_2(%arg0: i32) -> (i32, i32) {
    %c0_i32 = arith.constant 0 : i32
    %c0_i32_0 = arith.constant 0 : i32
    %c0_i32_1 = arith.constant 0 : i32
    return %c0_i32, %c0_i32_0 : i32, i32
  }
  func.func @transform_3(%arg0: i32) -> (i32, i32) {
    %c0_i32 = arith.constant 0 : i32
    %c0_i32_0 = arith.constant 0 : i32
    return %arg0, %c0_i32 : i32, i32
  }
}

</mosaic_0001>

<bundles_post_ra>
// kernel: logistic_regression_forward.1
= control target key start
LH: loop header
LB: loop body
LE: loop exit
PB: predicated region body
PF: predicated region fallthrough
CT: control target
= control target key end

     0   :  { %8 = vsyncpa [#allocation3], 0  ;;  %s1137_s0 = inlined_call_operand.vmem [shape: f32[2,1024], index: 0, kind: input, shape index: {}]   ;;  %s1138_s1 = inlined_call_operand.hbm [shape: bf16[1024,128], index: 1, kind: input, shape index: {}]   ;;  %s1139_s2 = inlined_call_operand.vmem [shape: f32[1,128], index: 2, kind: input, shape index: {}]   ;;  %s1140_s3 = inlined_call_operand.hbm [shape: f32[2,2], index: 3, kind: output, shape index: {}]  }
   0x1   :  { %9 = vsyncpa [#allocation4], 0  ;;  %s16_s14 = sshll.u32 %s1138_s1, 4  ;;  %s1098_s15 = smov [#allocation2]   ;;  %s17_s14 = int_to_ptr.hbm [resolvable:$true] %s16_s14 }
   0x2   :  { %s18_s16 = sshll.u32 %s1098_s15, 4  ;;  %s1099_s17 = smov 64   ;;  %s19_s16 = int_to_ptr.vmem [resolvable:$true] %s18_s16 }
   0x3   :  { %s1100_s18 = smov 4  }
   0x4   :  { %24 = dma.hbm_to_vmem [thread:$0]  %s17_s14, 8192, %s19_s16, [#allocation3], %s1099_s17, %s1099_s17, %s1100_s18  }
   0x5   :  { %1094 = dma.done.wait [#allocation3], 8192  }
   0x6   :  { %1095 = vsyncadd [#allocation3], 4294959104  ;;  %v980_v0 = vld [vmem:[#allocation2 + $0x38] sm:$0xff]  ;;  %v979_v4 = vld [vmem:[#allocation2 + $0x30] sm:$0xff]  ;;  %vm686_vm1 = vcmask 1041408   ;;  %s707_s26 = sshll.u32 %s1140_s3, 4  ;;  %s708_s26 = int_to_ptr.hbm [resolvable:$true] %s707_s26 }
   0x7   :  { %v988_v1 = vld [vmem:[#allocation2 + $0x78] sm:$0xff]  ;;  %578 = vmatpush.bf16.msra.mxu0 %v980_v0  ;;  %v987_v5 = vld [vmem:[#allocation2 + $0x70] sm:$0xff]  ;;  %v978_v8 = vld [vmem:[#allocation2 + $0x28] sm:$0xff]  ;;  %vm698_vm2 = vcmask 9216  }
   0x8   :  { %v996_v2 = vld [vmem:[#allocation2 + $0xb8] sm:$0xff]  ;;  %591 = vmatpush.bf16.msra.mxu1 %v988_v1  ;;  %v995_v6 = vld [vmem:[#allocation2 + $0xb0] sm:$0xff]  ;;  %v986_v9 = vld [vmem:[#allocation2 + $0x68] sm:$0xff] }
   0x9   :  { %v1004_v3 = vld [vmem:[#allocation2 + $0xf8] sm:$0xff]  ;;  %604 = vmatpush.bf16.msra.mxu2 %v996_v2  ;;  %v1003_v7 = vld [vmem:[#allocation2 + $0xf0] sm:$0xff]  ;;  %v994_v10 = vld [vmem:[#allocation2 + $0xa8] sm:$0xff] }
   0xa   :  { %617 = vmatpush.bf16.msra.mxu3 %v1004_v3  ;;  %v1002_v11 = vld [vmem:[#allocation2 + $0xe8] sm:$0xff]  ;;  %v977_v12 = vld [vmem:[#allocation2 + $0x20] sm:$0xff]  ;;  %v31_v16 = vld [vmem:[%s1137_s0] sm:$0xff] }
   0xb   :  { %579 = vmatpush.bf16.msra.mxu0 %v979_v4  ;;  %v985_v13 = vld [vmem:[#allocation2 + $0x60] sm:$0xff]  ;;  %v976_v17 = vld [vmem:[#allocation2 + $0x18] sm:$0xff]  ;;  %35 = vst [vmem:[#allocation1] ss:$4 sm:$0xff] %v31_v16  ;;  %v975_v21 = vld [vmem:[#allocation2 + $0x10] sm:$0xff] }
   0xc   :  { %592 = vmatpush.bf16.msra.mxu1 %v987_v5  ;;  %v993_v14 = vld [vmem:[#allocation2 + $0xa0] sm:$0xff]  ;;  %v984_v18 = vld [vmem:[#allocation2 + $0x58] sm:$0xff]  ;;  %v983_v22 = vld [vmem:[#allocation2 + $0x50] sm:$0xff] }
   0xd   :  { %605 = vmatpush.bf16.msra.mxu2 %v995_v6  ;;  %v1001_v15 = vld [vmem:[#allocation2 + $0xe0] sm:$0xff]  ;;  %v992_v19 = vld [vmem:[#allocation2 + $0x98] sm:$0xff]  ;;  %v991_v23 = vld [vmem:[#allocation2 + $0x90] sm:$0xff] }
   0xe   :  { %618 = vmatpush.bf16.msra.mxu3 %v1003_v7  ;;  %v1000_v20 = vld [vmem:[#allocation2 + $0xd8] sm:$0xff]  ;;  %v999_v24 = vld [vmem:[#allocation2 + $0xd0] sm:$0xff]  ;;  %v974_v25 = vld [vmem:[#allocation2 + $0x8] sm:$0xff] }
   0xf   :  { %580 = vmatpush.bf16.msra.mxu0 %v978_v8  ;;  %v982_v26 = vld [vmem:[#allocation2 + $0x48] sm:$0xff]  ;;  %v32_v29 = vld [vmem:[%s1137_s0 + $0x8] sm:$0xff]  ;;  %v1012_v34 = vld [vmem:[#allocation2 + $0x138] sm:$0xff] }
  0x10   :  { %593 = vmatpush.bf16.msra.mxu1 %v986_v9  ;;  %v990_v27 = vld [vmem:[#allocation2 + $0x88] sm:$0xff]  ;;  %v973_v30 = vld [vmem:[#allocation2] sm:$0xff]  ;;  %37 = vst [vmem:[#allocation1 + $0x20] ss:$4 sm:$0xff] %v32_v29  ;;  %v1020_v35 = vld [vmem:[#allocation2 + $0x178] sm:$0xff] }
  0x11   :  { %606 = vmatpush.bf16.msra.mxu2 %v994_v10  ;;  %v998_v28 = vld [vmem:[#allocation2 + $0xc8] sm:$0xff]  ;;  %v981_v31 = vld [vmem:[#allocation2 + $0x40] sm:$0xff]  ;;  %v1028_v40 = vld [vmem:[#allocation2 + $0x1b8] sm:$0xff] }
  0x12   :  { %619 = vmatpush.bf16.msra.mxu3 %v1002_v11  ;;  %v989_v32 = vld [vmem:[#allocation2 + $0x80] sm:$0xff]  ;;  %v40_v36 = vld.sshfl [vmem:[#allocation1 + $0x10] sm:$0xff pattern:$0x73625140]  ;;  %v1036_v41 = vld [vmem:[#allocation2 + $0x1f8] sm:$0xff] }
  0x13   :  { %581 = vmatpush.bf16.msra.mxu0 %v977_v12  ;;  %v997_v33 = vld [vmem:[#allocation2 + $0xc0] sm:$0xff]  ;;  %v38_v37 = vld.sshfl [vmem:[#allocation1] sm:$0xff pattern:$0x73625140]  ;;  %v56_v42 = vpack.c.bf16 %v40_v36, %v40_v36  ;;  %v1011_v46 = vld [vmem:[#allocation2 + $0x130] sm:$0xff] }
  0x14   :  { %594 = vmatpush.bf16.msra.mxu1 %v985_v13  ;;  %v41_v38 = vld.sshfl [vmem:[#allocation1 + $0x18] sm:$0xff pattern:$0x73625140]  ;;  %v39_v39 = vld.sshfl [vmem:[#allocation1 + $0x8] sm:$0xff pattern:$0x73625140]  ;;  %v54_v43 = vpack.c.bf16 %v38_v37, %v38_v37 }
  0x15   :  { %607 = vmatpush.bf16.msra.mxu2 %v993_v14  ;;  %v57_v44 = vpack.c.bf16 %v41_v38, %v41_v38  ;;  %v55_v45 = vpack.c.bf16 %v39_v39, %v39_v39  ;;  %v1019_v47 = vld [vmem:[#allocation2 + $0x170] sm:$0xff]  ;;  %v1010_v50 = vld [vmem:[#allocation2 + $0x128] sm:$0xff]  ;;  %v1009_v54 = vld [vmem:[#allocation2 + $0x120] sm:$0xff] }
  0x16   :  { %620 = vmatpush.bf16.msra.mxu3 %v1001_v15  ;;  %v1027_v48 = vld [vmem:[#allocation2 + $0x1b0] sm:$0xff]  ;;  %v1018_v51 = vld [vmem:[#allocation2 + $0x168] sm:$0xff]  ;;  %v1017_v55 = vld [vmem:[#allocation2 + $0x160] sm:$0xff] }
  0x17   :  { %582 = vmatpush.bf16.msra.mxu0 %v976_v17  ;;  %v1035_v49 = vld [vmem:[#allocation2 + $0x1f0] sm:$0xff]  ;;  %v1026_v52 = vld [vmem:[#allocation2 + $0x1a8] sm:$0xff]  ;;  %v1025_v56 = vld [vmem:[#allocation2 + $0x1a0] sm:$0xff] }
  0x18   :  { %595 = vmatpush.bf16.msra.mxu1 %v984_v18  ;;  %v1034_v53 = vld [vmem:[#allocation2 + $0x1e8] sm:$0xff]  ;;  %v1033_v57 = vld [vmem:[#allocation2 + $0x1e0] sm:$0xff]  ;;  %v1008_v58 = vld [vmem:[#allocation2 + $0x118] sm:$0xff] }
  0x19   :  { %608 = vmatpush.bf16.msra.mxu2 %v992_v19  ;;  %v1016_v59 = vld [vmem:[#allocation2 + $0x158] sm:$0xff]  ;;  %v1007_v62 = vld [vmem:[#allocation2 + $0x110] sm:$0xff]  ;;  %v1006_v2 = vld [vmem:[#allocation2 + $0x108] sm:$0xff] }
  0x1a   :  { %621 = vmatpush.bf16.msra.mxu3 %v1000_v20  ;;  %v1024_v60 = vld [vmem:[#allocation2 + $0x198] sm:$0xff]  ;;  %v1015_v63 = vld [vmem:[#allocation2 + $0x150] sm:$0xff]  ;;  %v1014_v3 = vld [vmem:[#allocation2 + $0x148] sm:$0xff] }
  0x1b   :  { %583 = vmatpush.bf16.msra.mxu0 %v975_v21  ;;  %v1032_v61 = vld [vmem:[#allocation2 + $0x1d8] sm:$0xff]  ;;  %v1023_v0 = vld [vmem:[#allocation2 + $0x190] sm:$0xff]  ;;  %v1022_v4 = vld [vmem:[#allocation2 + $0x188] sm:$0xff] }
  0x1c   :  { %596 = vmatpush.bf16.msra.mxu1 %v983_v22  ;;  %v1031_v1 = vld [vmem:[#allocation2 + $0x1d0] sm:$0xff]  ;;  %v1030_v5 = vld [vmem:[#allocation2 + $0x1c8] sm:$0xff]  ;;  %v1005_v6 = vld [vmem:[#allocation2 + $0x100] sm:$0xff] }
  0x1d   :  { %609 = vmatpush.bf16.msra.mxu2 %v991_v23  ;;  %v1013_v7 = vld [vmem:[#allocation2 + $0x140] sm:$0xff]  ;;  %v42_v10 = vld.sshfl [vmem:[#allocation1 + $0x20] sm:$0xff pattern:$0x73625140] }
  0x1e   :  { %622 = vmatpush.bf16.msra.mxu3 %v999_v24  ;;  %v1021_v8 = vld [vmem:[#allocation2 + $0x180] sm:$0xff]  ;;  %v44_v12 = vld.sshfl [vmem:[#allocation1 + $0x30] sm:$0xff pattern:$0x73625140]  ;;  %v58_v14 = vpack.c.bf16 %v42_v10, %v42_v10  ;;  %v1041_v24 = vld [vmem:[%s1139_s2] ss:$0 sm:$0xff] }
  0x1f   :  { %584 = vmatpush.bf16.msra.mxu0 %v974_v25  ;;  %v1029_v9 = vld [vmem:[#allocation2 + $0x1c0] sm:$0xff]  ;;  %v45_v13 = vld.sshfl [vmem:[#allocation1 + $0x38] sm:$0xff pattern:$0x73625140]  ;;  %v60_v16 = vpack.c.bf16 %v44_v12, %v44_v12  ;;  %s1101_s2 = smov [#allocation5]  }
  0x20   :  { %597 = vmatpush.bf16.msra.mxu1 %v982_v26  ;;  %v43_v11 = vld.sshfl [vmem:[#allocation1 + $0x28] sm:$0xff pattern:$0x73625140]  ;;  %v61_v17 = vpack.c.bf16 %v45_v13, %v45_v13  ;;  %s705_s23 = sshll.u32 %s1101_s2, 4  ;;  %s706_s23 = int_to_ptr.vmem [resolvable:$true] %s705_s23 }
  0x21   :  { %610 = vmatpush.bf16.msra.mxu2 %v990_v27  ;;  %v59_v15 = vpack.c.bf16 %v43_v11, %v43_v11 }
  0x22   :  { %623 = vmatpush.bf16.msra.mxu3 %v998_v28 }
  0x23   :  { %585 = vmatpush.bf16.msra.mxu0 %v973_v30 }
  0x24   :  { %598 = vmatpush.bf16.msra.mxu1 %v981_v31 }
  0x25   :  { %611 = vmatpush.bf16.msra.mxu2 %v989_v32 }
  0x26   :  { %624 = vmatpush.bf16.msra.mxu3 %v997_v33  ;;  %586 = vmatmul.bf16.vlgmr.msra.gmra.mxu0 %v54_v43  ;;  %v682_v33 = vlaneseq }
  0x27   :  { %630 = vmatpush.bf16.msrb.mxu0 %v1012_v34  ;;  %599 = vmatmul.bf16.vlgmr.msra.gmra.mxu1 %v55_v45 }
  0x28   :  { %643 = vmatpush.bf16.msrb.mxu1 %v1020_v35  ;;  %612 = vmatmul.bf16.vlgmr.msra.gmra.mxu2 %v56_v42  ;;  %v683_v35 = vand.u32 127, %v682_v33 }
  0x29   :  { %656 = vmatpush.bf16.msrb.mxu2 %v1028_v40  ;;  %625 = vmatmul.bf16.vlgmr.msra.gmra.mxu3 %v57_v44 }
  0x2a   :  { %669 = vmatpush.bf16.msrb.mxu3 %v1036_v41  ;;  %vm684_vm0 = vcmp.lt.s32.totalorder %v683_v35, 2 }
  0x2b   :  { %631 = vmatpush.bf16.msrb.mxu0 %v1011_v46 }
  0x2c   :  { %644 = vmatpush.bf16.msrb.mxu1 %v1019_v47 }
  0x2d   :  { %657 = vmatpush.bf16.msrb.mxu2 %v1027_v48 }
  0x2e   :  { %670 = vmatpush.bf16.msrb.mxu3 %v1035_v49 }
  0x2f   :  { %632 = vmatpush.bf16.msrb.mxu0 %v1010_v50 }
  0x30   :  { %645 = vmatpush.bf16.msrb.mxu1 %v1018_v51 }
  0x31   :  { %658 = vmatpush.bf16.msrb.mxu2 %v1026_v52 }
  0x32   :  { %671 = vmatpush.bf16.msrb.mxu3 %v1034_v53 }
  0x33   :  { %633 = vmatpush.bf16.msrb.mxu0 %v1009_v54 }
  0x34   :  { %646 = vmatpush.bf16.msrb.mxu1 %v1017_v55 }
  0x35   :  { %659 = vmatpush.bf16.msrb.mxu2 %v1025_v56 }
  0x36   :  { %672 = vmatpush.bf16.msrb.mxu3 %v1033_v57 }
  0x37   :  { %634 = vmatpush.bf16.msrb.mxu0 %v1008_v58 }
  0x38   :  { %647 = vmatpush.bf16.msrb.mxu1 %v1016_v59 }
  0x39   :  { %660 = vmatpush.bf16.msrb.mxu2 %v1024_v60 }
  0x3a   :  { %673 = vmatpush.bf16.msrb.mxu3 %v1032_v61 }
  0x3b   :  { %635 = vmatpush.bf16.msrb.mxu0 %v1007_v62 }
  0x3c   :  { %648 = vmatpush.bf16.msrb.mxu1 %v1015_v63 }
  0x3d   :  { %661 = vmatpush.bf16.msrb.mxu2 %v1023_v0 }
  0x3e   :  { %674 = vmatpush.bf16.msrb.mxu3 %v1031_v1 }
  0x3f   :  { %636 = vmatpush.bf16.msrb.mxu0 %v1006_v2 }
  0x40   :  { %649 = vmatpush.bf16.msrb.mxu1 %v1014_v3 }
  0x41   :  { %662 = vmatpush.bf16.msrb.mxu2 %v1022_v4 }
  0x42   :  { %675 = vmatpush.bf16.msrb.mxu3 %v1030_v5 }
  0x43   :  { %637 = vmatpush.bf16.msrb.mxu0 %v1005_v6 }
  0x44   :  { %650 = vmatpush.bf16.msrb.mxu1 %v1013_v7 }
  0x45   :  { %663 = vmatpush.bf16.msrb.mxu2 %v1021_v8 }
  0x46   :  { %676 = vmatpush.bf16.msrb.mxu3 %v1029_v9  ;;  %638 = vmatmul.bf16.vlgmr.msrb.gmra.mxu0 %v58_v14 }
  0x47   :  { %651 = vmatmul.bf16.vlgmr.msrb.gmra.mxu1 %v59_v15 }
  0x48   :  { %664 = vmatmul.bf16.vlgmr.msrb.gmra.mxu2 %v60_v16 }
  0x49   :  { %677 = vmatmul.bf16.vlgmr.msrb.gmra.mxu3 %v61_v17 }
  0xa3   :  { %v587_v18 = vpop.f32.mrf.mxu0 }
  0xa4   :  { %v600_v19 = vpop.f32.mrf.mxu1  ;;  %v588_v27 = vadd.f32 %v1041_v24, %v587_v18 }
  0xa6   :  { %v601_v28 = vadd.f32 %v600_v19, %v588_v27 }
  0xab   :  { %v613_v20 = vpop.f32.mrf.mxu2  ;;  %v589_v22 = vpop.f32.mrf.mxu0 }
  0xac   :  { %v626_v21 = vpop.f32.mrf.mxu3  ;;  %v602_v23 = vpop.f32.mrf.mxu1  ;;  %v614_v29 = vadd.f32 %v613_v20, %v601_v28 }
  0xae   :  { %v627_v30 = vadd.f32 %v626_v21, %v614_v29 }
  0xb3   :  { %v615_v25 = vpop.f32.mrf.mxu2 }
  0xb4   :  { %v628_v26 = vpop.f32.mrf.mxu3 }
  0xc3   :  { %v639_v31 = vpop.f32.mrf.mxu0 }
  0xc4   :  { %v652_v32 = vpop.f32.mrf.mxu1  ;;  %v640_v34 = vadd.f32 %v639_v31, %v627_v30 }
  0xc6   :  { %v653_v36 = vadd.f32 %v652_v32, %v640_v34 }
  0xcb   :  { %v665_v37 = vpop.f32.mrf.mxu2  ;;  %v641_v40 = vpop.f32.mrf.mxu0 }
  0xcc   :  { %v678_v38 = vpop.f32.mrf.mxu3  ;;  %v666_v39 = vadd.f32 %v665_v37, %v653_v36  ;;  %v654_v41 = vpop.f32.mrf.mxu1 }
  0xce   :  { %v679_v42 = vadd.f32 %v678_v38, %v666_v39 }
  0xd0   :  { %v685_v43 = vsel %vm684_vm0, %v679_v42, -1e+30 }
  0xd1   :  { %v687_v44 = vsel %vm686_vm1, %v685_v43, -inf }
  0xd2   :  { %688 = vmax.xlane.f32.xlu0 %v687_v44 }
  0xd3   :  { %v667_v45 = vpop.f32.mrf.mxu2 }
  0xd4   :  { %v680_v46 = vpop.f32.mrf.mxu3 }
 0x145   :  { %v689_v47 = vpop.xlane.xlu0 %688 }
 0x146   :  { %v690_v48 = vsub.f32 %v685_v43, %v689_v47 }
 0x148   :  { %v691_v49 = vmul.f32 1.442695, %v690_v48 }
 0x14a   :  { %1042 = vpow2.f32 %v691_v49 }
 0x150   :  { %v1043_v50 = vpop.eup %1042 }
 0x151   :  { %v693_v51 = vsel %vm686_vm1, %v1043_v50, 0.0 }
 0x152   :  { %694 = vadd.xlane.f32.xlu0 %v693_v51 }
 0x1c5   :  { %v695_v52 = vpop.xlane.xlu0 %694 }
 0x1c6   :  { %1044 = vrcp.f32 %v695_v52 }
 0x1cc   :  { %v1045_v53 = vpop.eup %1044 }
 0x1cd   :  { %v697_v54 = vmul.f32 %v1045_v53, %v1043_v50 }
 0x1cf   :  { %699 = vst.msk [vmem:[#allocation5] sm:$0x3] %vm698_vm2, %v697_v54 }
 0x1d0   :  { %710 = dma.vmem_to_hbm [thread:$0]  %s706_s23, 32, %s708_s26, [#allocation4]  }
 0x1d1   :  { %1096 = dma.done.wait [#allocation4], 32  }
 0x1d2   :  { %1097 = vsyncadd [#allocation4], 4294967264 }
 0x1d3   :  { %715 = vsyncpa [#allocation3], 1 }
 0x1d4   :  { %716 = vsyncpa [#allocation4], 1 }

</bundles_post_ra>
